<compile_context>
chip_gen: v6e
topology: v6e:2x2x1
jax: 0.10.0
libtpu: 0.0.40
codegen_flags: <defaults>
</compile_context>

<pallas_src>
import functools

import jax
import jax.numpy as jnp
from jax.experimental import pallas as pl
from jax.experimental.pallas import tpu as pltpu


def _round_up(x, m):
    return ((x + m - 1) // m) * m


# ----------------------------- Pallas kernel -------------------------------

def _add_pos_emb_kernel(f_ref, o_ref, *, C, H, W, spatial_block):
    """f_ref: (TB, C, *S)   o_ref: (TB, C+2, *S).

    The trailing spatial dims S flatten (row-major) onto the H*W axis;
    prod(S) == spatial_block, and spatial grid step j covers flattened spatial
    indices [j*spatial_block, (j+1)*spatial_block).
    """
    j = pl.program_id(1)
    TB = o_ref.shape[0]
    sdims = tuple(o_ref.shape[2:])
    ishape = (1, 1) + sdims

    # Pass the C input channels straight through (dense full-tile store in the
    # packed (S, 128) layout).
    o_ref[:, :C] = f_ref[...]

    # Flattened spatial index p = h * W + w for every element of this block.
    if len(sdims) == 2:                      # packed layout: (S_blk, 128)
        lanes = sdims[1]
        p = (jax.lax.broadcasted_iota(jnp.int32, ishape, 2) * lanes
             + jax.lax.broadcasted_iota(jnp.int32, ishape, 3))
    else:                                    # flat layout: (tile_hw,)
        p = jax.lax.broadcasted_iota(jnp.int32, ishape, 2)
    p = p + j * spatial_block

    # h = p // W, w = p % W (shift/AND keeps the VALU slot clear when W is a
    # power of two; otherwise one div + one mul/sub).
    if (W & (W - 1)) == 0:
        shift = W.bit_length() - 1
        h = p >> shift
        w = p & (W - 1)
    else:
        h = p // W
        w = p - h * W

    h_scale = jnp.float32(2.0 / max(H - 1, 1))   # linspace(-1, 1, N) step
    w_scale = jnp.float32(2.0 / max(W - 1, 1))
    h_grid = h.astype(jnp.float32) * h_scale - 1.0
    w_grid = w.astype(jnp.float32) * w_scale - 1.0

    # Single merged store of both positional channels.
    pos = jnp.concatenate([h_grid, w_grid], axis=1).astype(o_ref.dtype)
    o_ref[:, C:] = jnp.broadcast_to(pos, (TB, 2) + sdims)


# ------------------------------- JAX wrapper --------------------------------

def add_pos_emb(f_nchw, *, target_step_bytes=8 << 20, vmem_tile_budget=24 << 20):
    """Pallas implementation of AddPosEmb.forward for NCHW input."""
    B, C, H, W = f_nchw.shape
    HW = H * W
    dtype = f_nchw.dtype
    itemsize = jnp.dtype(dtype).itemsize
    C_out = C + 2

    if HW % 128 == 0:
        # -------------------- packed (S, 128) layout --------------------
        S_tot = HW // 128
        f_view = f_nchw.reshape(B, C, S_tot, 128)          # free reshape

        row_stream = (C + C_out) * 128 * itemsize           # streamed / row / batch
        row_vmem = 2 * row_stream                            # double-buffered in+out
        rows_budget = max(8, min(target_step_bytes // row_stream,
                                 vmem_tile_budget // row_vmem))

        if rows_budget >= S_tot:
            S_blk = S_tot                                    # whole spatial extent/step
            TB = int(min(B, max(1, rows_budget // max(S_tot, 1))))
        else:
            S_blk = int(min((rows_budget // 8) * 8, max(8, (S_tot // 8) * 8)))
            TB = 1

        # Keep >=2 grid steps when possible so v7x megacore uses both cores.
        if pl.cdiv(B, TB) * pl.cdiv(S_tot, S_blk) < 2:
            if TB >= 2:
                TB //= 2
            elif S_blk >= 16:
                S_blk = max(8, ((-(-S_tot // 2)) // 8) * 8)

        grid = (pl.cdiv(B, TB), pl.cdiv(S_tot, S_blk))
        blk_in, blk_out = (TB, C, S_blk, 128), (TB, C_out, S_blk, 128)
        index_map = lambda b, j: (b, 0, j, 0)
        spatial_block = S_blk * 128
        vmem_needed = 2 * TB * (C + C_out) * _round_up(S_blk, 8) * 128 * itemsize
    else:
        # ----------- fallback: spatial flattened onto the lane axis -----------
        # Bounded, 128-multiple lane tiles (tail block masked by Pallas); never
        # an unbounded whole-HW block.
        f_view = f_nchw.reshape(B, C, HW)
        lane_stream = (C + C_out) * itemsize
        lane_vmem = 2 * (_round_up(C, 8) + _round_up(C_out, 8)) * itemsize
        lanes_budget = max(128, min(target_step_bytes // lane_stream,
                                    vmem_tile_budget // lane_vmem))

        if HW <= 128 or lanes_budget >= HW:
            tile_hw = HW                                     # full extent (small/fits)
            TB = int(min(B, max(1, lanes_budget // max(HW, 1))))
        else:
            tile_hw = int(min((lanes_budget // 128) * 128, (HW // 128) * 128))
            TB = 1

        if pl.cdiv(B, TB) * pl.cdiv(HW, tile_hw) < 2 and TB >= 2:
            TB //= 2

        grid = (pl.cdiv(B, TB), pl.cdiv(HW, tile_hw))
        blk_in, blk_out = (TB, C, tile_hw), (TB, C_out, tile_hw)
        index_map = lambda b, j: (b, 0, j)
        spatial_block = tile_hw
        vmem_needed = (2 * TB * (_round_up(C, 8) + _round_up(C_out, 8))
                       * _round_up(tile_hw, 128) * itemsize)

    kernel = functools.partial(_add_pos_emb_kernel, C=C, H=H, W=W,
                               spatial_block=spatial_block)

    bytes_accessed = (B * C * HW + B * C_out * HW) * itemsize
    vmem_limit = int(min(max(vmem_needed + (4 << 20), 16 << 20), 40 << 20))

    out_flat = pl.pallas_call(
        kernel,
        out_shape=jax.ShapeDtypeStruct((B, C_out) + f_view.shape[2:], dtype),
        grid=grid,
        in_specs=[pl.BlockSpec(blk_in, index_map)],
        out_specs=pl.BlockSpec(blk_out, index_map),
        compiler_params=pltpu.CompilerParams(
            dimension_semantics=("parallel", "parallel"),
            vmem_limit_bytes=vmem_limit),
        cost_estimate=pl.CostEstimate(
            flops=8 * B * HW, transcendentals=0,
            bytes_accessed=bytes_accessed),
    )(f_view)

    return out_flat.reshape(B, C_out, H, W)


# ------------------------- pure-JAX reference check -------------------------

def add_pos_emb_ref(f):
    B, C, H, W = f.shape
    h_idx = jnp.linspace(-1.0, 1.0, H)
    w_idx = jnp.linspace(-1.0, 1.0, W)
    h_grid, w_grid = jnp.meshgrid(h_idx, w_idx, indexing="ij")
    pos = jnp.stack([h_grid, w_grid], axis=0)[None]            # (1, 2, H, W)
    pos = jnp.broadcast_to(pos, (B, 2, H, W)).astype(f.dtype)
    return jnp.concatenate([f, pos], axis=1)


# ---------------------------------- main ------------------------------------

if __name__ == "__main__":
    key = jax.random.PRNGKey(0)

    # Packed (HW % 128 == 0) path.
    B, C, H, W = 2, 4, 16, 16
    f = jax.random.normal(key, (B, C, H, W), jnp.float32)
    out = jax.block_until_ready(add_pos_emb(f))
    ref = jax.block_until_ready(add_pos_emb_ref(f))
    assert out.shape == (B, C + 2, H, W), out.shape
    assert jnp.allclose(out, ref, rtol=1e-5, atol=1e-5), \
        float(jnp.max(jnp.abs(out - ref)))

    # Fallback (HW not a multiple of 128) path.
    B2, C2, H2, W2 = 2, 4, 7, 9
    f2 = jax.random.normal(jax.random.PRNGKey(1), (B2, C2, H2, W2), jnp.float32)
    out2 = jax.block_until_ready(add_pos_emb(f2))
    ref2 = jax.block_until_ready(add_pos_emb_ref(f2))
    assert out2.shape == (B2, C2 + 2, H2, W2), out2.shape
    assert jnp.allclose(out2, ref2, rtol=1e-5, atol=1e-5), \
        float(jnp.max(jnp.abs(out2 - ref2)))

    print("KERNEL_OK")
</pallas_src>

<mosaic_0001>
module attributes {stable_mosaic.version = 11 : i64} {
  func.func @_add_pos_emb_kernel(%arg0: i32, %arg1: i32, %arg2: memref<1x4x2x128xf32, #tpu.memory_space<vmem>>, %arg3: memref<1x6x2x128xf32, #tpu.memory_space<vmem>>) attributes {dimension_semantics = [#tpu.dimension_semantics<parallel>, #tpu.dimension_semantics<parallel>], iteration_bounds = array<i64: 2, 1>, scalar_prefetch = 0 : i64, scratch_operands = 0 : i64, tpu.core_type = #tpu.core_type<tc>, window_params = [{transform_indices = @transform_0, window_bounds = array<i64: 1, 4, 2, 128>}, {transform_indices = @transform_1, window_bounds = array<i64: 1, 6, 2, 128>}]} {
    %c0 = arith.constant 0 : index
    %c0_0 = arith.constant 0 : index
    %c0_1 = arith.constant 0 : index
    %c0_2 = arith.constant 0 : index
    %0 = vector.load %arg2[%c0, %c0_0, %c0_1, %c0_2] : memref<1x4x2x128xf32, #tpu.memory_space<vmem>>, vector<1x4x2x128xf32>
    %c0_3 = arith.constant 0 : index
    %c0_4 = arith.constant 0 : index
    %c0_5 = arith.constant 0 : index
    %c0_6 = arith.constant 0 : index
    %1 = vector.load %arg3[%c0_3, %c0_4, %c0_5, %c0_6] : memref<1x6x2x128xf32, #tpu.memory_space<vmem>>, vector<1x4x2x128xf32>
    tpu.vector_store %arg3[%c0_3, %c0_4, %c0_5, %c0_6], %0 {strides = array<i32>} : memref<1x6x2x128xf32, #tpu.memory_space<vmem>>, vector<1x4x2x128xf32>,
    %2 = tpu.iota {dimensions = array<i32: 2>} : vector<1x1x2x128xi32>
    %c128_i32 = arith.constant 128 : i32
    %3 = vector.broadcast %c128_i32 : i32 to vector<1x1x2x128xi32>
    %4 = arith.muli %2, %3 : vector<1x1x2x128xi32>
    %5 = tpu.iota {dimensions = array<i32: 3>} : vector<1x1x2x128xi32>
    %6 = arith.addi %4, %5 : vector<1x1x2x128xi32>
    %c256_i32 = arith.constant 256 : i32
    %7 = arith.muli %arg1, %c256_i32 : i32
    %8 = vector.broadcast %7 : i32 to vector<1x1x2x128xi32>
    %9 = arith.addi %6, %8 : vector<1x1x2x128xi32>
    %c4_i32 = arith.constant 4 : i32
    %10 = vector.broadcast %c4_i32 : i32 to vector<1x1x2x128xi32>
    %11 = arith.shrsi %9, %10 : vector<1x1x2x128xi32>
    %c15_i32 = arith.constant 15 : i32
    %12 = vector.broadcast %c15_i32 : i32 to vector<1x1x2x128xi32>
    %13 = arith.andi %9, %12 : vector<1x1x2x128xi32>
    %14 = arith.sitofp %11 : vector<1x1x2x128xi32> to vector<1x1x2x128xf32>
    %cst = arith.constant 0.13333334 : f32
    %15 = vector.broadcast %cst : f32 to vector<1x1x2x128xf32>
    %16 = arith.mulf %14, %15 : vector<1x1x2x128xf32>
    %cst_7 = arith.constant 1.000000e+00 : f32
    %17 = vector.broadcast %cst_7 : f32 to vector<1x1x2x128xf32>
    %18 = arith.subf %16, %17 : vector<1x1x2x128xf32>
    %19 = arith.sitofp %13 : vector<1x1x2x128xi32> to vector<1x1x2x128xf32>
    %cst_8 = arith.constant 0.13333334 : f32
    %20 = vector.broadcast %cst_8 : f32 to vector<1x1x2x128xf32>
    %21 = arith.mulf %19, %20 : vector<1x1x2x128xf32>
    %cst_9 = arith.constant 1.000000e+00 : f32
    %22 = vector.broadcast %cst_9 : f32 to vector<1x1x2x128xf32>
    %23 = arith.subf %21, %22 : vector<1x1x2x128xf32>
    %24 = tpu.concatenate %18, %23 in 1 : vector<1x1x2x128xf32>, vector<1x1x2x128xf32> -> vector<1x2x2x128xf32>
    %c0_10 = arith.constant 0 : index
    %c4 = arith.constant 4 : index
    %c0_11 = arith.constant 0 : index
    %c0_12 = arith.constant 0 : index
    %25 = vector.load %arg3[%c0_10, %c4, %c0_11, %c0_12] : memref<1x6x2x128xf32, #tpu.memory_space<vmem>>, vector<1x2x2x128xf32>
    tpu.vector_store %arg3[%c0_10, %c4, %c0_11, %c0_12], %24 {strides = array<i32>} : memref<1x6x2x128xf32, #tpu.memory_space<vmem>>, vector<1x2x2x128xf32>,
    return
  }
  func.func @transform_0(%arg0: i32, %arg1: i32) -> (i32, i32, i32, i32) {
    %c0_i32 = arith.constant 0 : i32
    %c0_i32_0 = arith.constant 0 : i32
    %c0_i32_1 = arith.constant 0 : i32
    return %arg0, %c0_i32, %arg1, %c0_i32_0 : i32, i32, i32, i32
  }
  func.func @transform_1(%arg0: i32, %arg1: i32) -> (i32, i32, i32, i32) {
    %c0_i32 = arith.constant 0 : i32
    %c0_i32_0 = arith.constant 0 : i32
    %c0_i32_1 = arith.constant 0 : i32
    return %arg0, %c0_i32, %arg1, %c0_i32_0 : i32, i32, i32, i32
  }
}

</mosaic_0001>

<bundles_post_ra>
// kernel: tpu_custom_call.1
= control target key start
LH: loop header
LB: loop body
LE: loop exit
PB: predicated region body
PF: predicated region fallthrough
CT: control target
= control target key end

     0   :  { %6 = vsyncpa [#allocation3], 0  ;;  %s638_s0 = inlined_call_operand.hbm [shape: f32[2,4,2,128], index: 0, kind: input, shape index: {}]   ;;  %s639_s1 = inlined_call_operand.hbm [shape: f32[2,6,2,128], index: 1, kind: output, shape index: {}]  }
   0x1   :  { %8 = vsyncpa [#allocation3 + $0x1], 0 }
   0x2   :  { %9 = vsyncpa [#allocation4], 0 }
   0x3   :  { %11 = vsyncpa [#allocation4 + $0x1], 0  ;;  %s491_s6 = smov 0   ;;  %s493_s7 = smov 0  }
   0x4   :  { %s495_s8 = smov 0   ;;  %s497_s9 = smov 0  }
   0x5   :  { %s499_s10 = smov 0   ;;  %s501_s11 = smov 0  }
   0x6 LB: > { %s280_s12 = sadd.s32 4294967295, %s473_s11   ;;  %s281_s13 = sadd.s32 4294967294, %s473_s11   ;;  %s473_s11 = sphi %s501_s11, %s17_s11   ;;  %s469_s10 = sphi %s499_s10, %s650_s10   ;;  %s465_s9 = sphi %s497_s9, %s649_s9   ;;  %s461_s8 = sphi %s495_s8, %s648_s8   ;;  %s457_s7 = sphi %s493_s7, %s647_s7   ;;  %s453_s6 = sphi %s491_s6, %s646_s6  }
   0x7   : > { %s29_s14 = sadd.s32 1, %s469_s10  ;;  %s38_s15 = sadd.s32 1, %s461_s8 }
   0x8   : > { %p31_p0 = scmp.ge.s32.totalorder %s29_s14, 2  ;;  %p45_p1 = scmp.ne.s32.totalorder %s461_s8, %s457_s7 }
   0x9   : > { %p46_p2 = scmp.eq.s32.totalorder %s473_s11, 0  ;;  %p51_p3 = scmp.ne.s32.totalorder %s457_s7, %s453_s6 }
   0xa   : > { %s652_s14 = smov (%p31_p0, %s29_s14), 0  ;;  %p52_p5 = scmp.eq.s32.totalorder %s280_s12, 0 }
   0xb   : > { %p532_p4 = por %p46_p2, %p45_p1  ;;  %s33_s17 = ssub.s32 %s469_s10, %s652_s14 }
   0xc   : > { %p77_p6 = scmp.eq.s32.totalorder %s280_s12, 1  ;;  %p36_p7 = scmp.eq.s32.totalorder %s33_s17, 0 }
   0xd   : > { %p538_p8 = por %p52_p5, %p51_p3  ;;  %p83_p10 = scmp.eq.s32.totalorder %s281_s13, 1 }
   0xe   : > { %p542_p9 = por %p77_p6, %p45_p1  ;;  %p311_p13 = scmp.lt.s32.totalorder %s473_s11, 2 }
   0xf   : > { %s547_s20 = scalar_select %p36_p7, %s461_s8, %s38_s15  }
  0x10   : > { %p549_p11 = por %p83_p10, %p51_p3  ;;  %s103_s22 = sand.u32 1, %s461_s8  }
  0x11   : > { %s284_s23 = sshll.u32 %s103_s22, 3  ;;  %s296_s24 = sshll.u32 %s469_s10, 7 }
  0x12   : > { %s114_s27 = scalar_lea.hbm %s638_s0, %s296_s24  ;;  %s107_s28 = scalar_lea.vmem [#allocation2], %s284_s23 }
  0x13   : > { %s115_s29 = sshll.u32 %s107_s28, 4  ;;  %p562_p0 = pnand %p311_p13, %p532_p4  ;;  %s116_s29 = int_to_ptr.vmem [resolvable:$true] %s115_s29 }
  0x14   : > { %p287_p1 = scmp.ge.s32.totalorder %s473_s11, 1  ;;  %s104_s2 = scalar_lea.sflag [#allocation3], %s103_s22 }
  0x15   : > { %p367_p2 = pneg %p562_p0  ;;  %s378_s3 = scalar_lea.vmem %s116_s29, 128 }
  0x16   : > { %p379_p3 = scmp.ne.s32.totalorder %s116_s29, %s378_s3  ;;  %s475_s4 = smov [#allocation2]  }
  0x17   : > { %s383_s5 = sshll.u32 %s475_s4, 4  ;;  %s384_s5 = int_to_ptr.vmem [resolvable:$false] %s383_s5 }
  0x18   : > { %p381_p5 = pnand %p379_p3, %p367_p2  ;;  %s385_s12 = scalar_lea.vmem %s384_s5, 256 }
  0x19   : > { %p386_p7 = scmp.lt.s32.totalorder %s116_s29, %s384_s5  ;;  %p387_p10 = scmp.lt.s32.totalorder %s385_s12, %s378_s3 }
  0x1a   : > { %p382_p6 = pneg %p381_p5 }
  0x1b   : > { %p388_p12 = por %p387_p10, %p386_p7 }
  0x1d   : > { %p389_p4 = pnand %p388_p12, %p382_p6 }
  0x1f   : > { %392 = shalt.err (!%p389_p4)
}
  0x20   : > { %s476_s13 = smov 32   ;;  %s477_s15 = smov 2  }
  0x21   : > { %306 = dma.hbm_to_vmem [thread:$0]  (!%p562_p0), %s114_s27, 128, %s116_s29, %s104_s2, %s476_s13, %s476_s13, %s477_s15  }
  0x22   : > { %p123_p13 = scmp.lt.s32.totalorder %s473_s11, 3 }
  0x24   : > { %p124_p2 = pnand %p287_p1, %p123_p13 }
  0x25   : > { %s575_s16 = sand.u32 (!%p124_p2), 1, %s457_s7  }
  0x26   : > { %127 = sbr.rel (%p124_p2) target bundleno = 74 (0x4a), region = 24  ;;  %s288_s17 = sshll.u32 (!%p124_p2), %s575_s16, 3 }
  0x27   : > { %s130_s22 = scalar_lea.sflag (!%p124_p2), [#allocation3], %s575_s16  ;;  %s133_s23 = scalar_lea.vmem (!%p124_p2), [#allocation2], %s288_s17 }
  0x2b   : > { %444 = dma.done.wait (%p538_p8), %s130_s22, 128  }
  0x2c   : > { %446 = vsyncadd (%p538_p8), %s130_s22, 4294967168  ;;  %v160_v0 = vlaneseq  ;;  %s297_s24 = smul.u32 12, %s575_s16  ;;  %v152_v5 = vld [vmem:[%s133_s23] sm:$0xff]   ;;  %s181_s30 = scalar_lea.sflag [#allocation4], %s575_s16 }
  0x2d   : > { %s298_s26 = smul.u32 192, %s465_s9  ;;  %s478_s9 = smov [#allocation5]  }
  0x2e   : > { %v161_v1 = vshrl.u32 %v160_v0, 7  ;;  %v164_v2 = vand.u32 127, %v160_v0  ;;  %s151_s25 = scalar_lea.vmem [#allocation5], %s297_s24  ;;  %s397_s3 = sshll.u32 %s478_s9, 4  ;;  %s398_s3 = int_to_ptr.vmem [resolvable:$false] %s397_s3 }
  0x2f   : > { %156 = vst [vmem:[%s151_s25] sm:$0xff] %v152_v5   ;;  %s195_s18 = sshll.u32 %s151_s25, 4  ;;  %s590_s29 = scalar_lea.hbm %s639_s1, %s298_s26  ;;  %s585_s18 = int_to_ptr.vmem [resolvable:$true] %s195_s18 }
  0x30   : > { %v162_v3 = vmul.u32 128, %v161_v1  ;;  %s393_s2 = scalar_lea.vmem %s585_s18, 192  ;;  %s399_s4 = scalar_lea.vmem %s398_s3, 384 }
  0x31   : > { %p394_p8 = scmp.ne.s32.totalorder %s585_s18, %s393_s2  ;;  %p400_p1 = scmp.lt.s32.totalorder %s585_s18, %s398_s3 }
  0x32   : > { %v165_v4 = vadd.s32 %v164_v2, %v162_v3  ;;  %p401_p3 = scmp.lt.s32.totalorder %s399_s4, %s393_s2 }
  0x33   : > { %p395_p12 = pnand %p394_p8, %p542_p9 }
  0x34   : > { %v169_v6 = vshra.s32 %v165_v4, 4  ;;  %v170_v7 = vand.u32 15, %v165_v4  ;;  %p402_p5 = por %p401_p3, %p400_p1 }
  0x35   : > { %p396_p0 = pneg %p395_p12 }
  0x36   : > { %v171_v8 = vcvt.s32.f32 %v169_v6  ;;  %v174_v9 = vcvt.s32.f32 %v170_v7 }
  0x37   : > { %p403_p6 = pnand %p402_p5, %p396_p0 }
  0x38   : > { %v172_v10 = vmul.f32 0.13333334, %v171_v8  ;;  %v175_v11 = vmul.f32 0.13333334, %v174_v9 }
  0x3a   : > { %v289_v12 = vadd.f32 -1.0, %v172_v10  ;;  %v290_v13 = vadd.f32 -1.0, %v175_v11 }
  0x3c   : > { %291 = vst [vmem:[%s151_s25 + $0x8] sm:$0x3] %v289_v12  ;;  %292 = vst [vmem:[%s151_s25 + $0xa] sm:$0x3] %v290_v13 }
  0x3d   : > { %406 = shalt.err (!%p403_p6)
}
  0x3e   : > { %s407_s5 = scalar_lea.hbm %s590_s29, 192  ;;  %s411_s15 = scalar_lea.hbm %s639_s1, 384 }
  0x3f   : > { %p408_p7 = scmp.ne.s32.totalorder %s590_s29, %s407_s5  ;;  %p412_p13 = scmp.lt.s32.totalorder %s590_s29, %s639_s1 }
  0x40   : > { %p413_p2 = scmp.lt.s32.totalorder %s411_s15, %s407_s5 }
  0x41   : > { %p409_p10 = pnand %p408_p7, %p542_p9 }
  0x42   : > { %p414_p8 = por %p413_p2, %p412_p13 }
  0x43   : > { %p410_p4 = pneg %p409_p10 }
  0x45   : > { %p415_p12 = pnand %p414_p8, %p410_p4 }
  0x47   : > { %418 = shalt.err (!%p415_p12)
}
  0x48   : > { %s479_s23 = smov 32   ;;  %s480_s24 = smov 2  }
  0x49   : > { %301 = dma.vmem_to_hbm [thread:$0]  (%p542_p9), %s585_s18, 192, %s590_s29, %s181_s30, %s479_s23, %s479_s23, %s480_s24  }
  0x4a PF: > { %s210_s25 = sand.u32 1, %s453_s6   ;;  %p645_p0 = scmp.ge.s32.totalorder %s473_s11, 2 }
  0x4b   : > { %s211_s26 = scalar_lea.sflag [#allocation4], %s210_s25 }
  0x4c   : > { %p308_p1 = pnand %p645_p0, %p549_p11 }
  0x4e   : > { %p309_p3 = pneg %p308_p1 }
  0x50   : > { %448 = dma.done.wait (%p309_p3), %s211_s26, 192  }
  0x51   : > { %450 = vsyncadd (%p309_p3), %s211_s26, 4294967104  ;;  %s17_s11 = sadd.s32 1, %s473_s11   ;;  %s646_s6 = smov %s457_s7 }
  0x52   : > { %p14_p5 = scmp.ge.s32.totalorder %s17_s11, 4   ;;  %s647_s7 = smov %s461_s8 }
  0x53   : > { %s648_s8 = smov %s547_s20  ;;  %s649_s9 = smov %s469_s10 }
  0x54   : > { %s650_s10 = smov %s652_s14  ;;  %16 = sbr.rel (!%p14_p5) target bundleno = 6 (0x6), region = 70 }
  0x59   :  { %216 = vsyncpa [#allocation3], 1 }
  0x5a   :  { %218 = vsyncpa [#allocation3 + $0x1], 1 }
  0x5b   :  { %219 = vsyncpa [#allocation4], 1 }
  0x5c   :  { %221 = vsyncpa [#allocation4 + $0x1], 1 }

</bundles_post_ra>
